<compile_context>
chip_gen: v7x
topology: tpu7x:2x2x1
jax: 0.10.0
libtpu: 0.0.40
codegen_flags: <defaults>
</compile_context>

<pallas_src>
import jax
import jax.numpy as jnp
from jax.experimental import pallas as pl
from jax.experimental.pallas import tpu as pltpu


def _multi_loss_kernel(loss_ref, logvar_ref, out_ref):
    # loss_ref, logvar_ref: (1, L) f32 in VMEM (full-array blocks; L < 128 means
    #   a masked single-vreg vld, which is cheaper than any host-side padding).
    # out_ref: (1, 1) f32 in SMEM (scalar result on the scalar path).
    ls = loss_ref[...]                 # (1, L) single full-block load, no slicing
    lv = logvar_ref[...]               # (1, L)
    precision = jnp.exp(-lv)           # EUP exp (off the VALU critical slot)
    out_ref[0, 0] = jnp.sum(precision * ls + lv)   # VPU mul/add + XLU reduce


def _multi_loss_fwd_pallas(loss_vec, log_vars):
    """loss_vec: (L,) stacked scalar losses; log_vars: (L,) parameter. Returns scalar."""
    L = loss_vec.shape[0]
    assert log_vars.shape[0] == L
    ls2d = loss_vec.astype(jnp.float32).reshape(1, L)
    lv2d = log_vars.astype(jnp.float32).reshape(1, L)
    out = pl.pallas_call(
        _multi_loss_kernel,
        out_shape=jax.ShapeDtypeStruct((1, 1), jnp.float32),
        in_specs=[
            pl.BlockSpec((1, L), lambda: (0, 0),
                         memory_space=pltpu.MemorySpace.VMEM),
            pl.BlockSpec((1, L), lambda: (0, 0),
                         memory_space=pltpu.MemorySpace.VMEM),
        ],
        out_specs=pl.BlockSpec(memory_space=pltpu.MemorySpace.SMEM),
    )(ls2d, lv2d)
    # Stays inside the jitted region -> this slice fuses away.
    return out[0, 0]


@jax.custom_vjp
def custom_multi_loss_layer(loss_vec, log_vars):
    return _multi_loss_fwd_pallas(loss_vec, log_vars)


def _cml_fwd(loss_vec, log_vars):
    return _multi_loss_fwd_pallas(loss_vec, log_vars), (loss_vec, log_vars)


def _cml_bwd(residuals, g):
    # Analytic backward in plain jnp (2 vregs of VPU work; a second Pallas
    # launch would only double the fixed overhead).
    loss_vec, log_vars = residuals
    lv = log_vars.astype(jnp.float32)
    ls = loss_vec.astype(jnp.float32)
    precision = jnp.exp(-lv)
    d_loss = (g * precision).astype(loss_vec.dtype)
    d_logvar = (g * (1.0 - precision * ls)).astype(log_vars.dtype)
    return d_loss, d_logvar


custom_multi_loss_layer.defvjp(_cml_fwd, _cml_bwd)


if __name__ == "__main__":
    loss_num = 4

    # Parameter init matching nn.Parameter(torch.zeros(loss_num)).
    log_vars = jnp.zeros((loss_num,), dtype=jnp.float32)

    # Deterministic example "losses" (each would be a scalar loss in PyTorch).
    key = jax.random.PRNGKey(0)
    loss_vec = jax.random.uniform(key, (loss_num,), dtype=jnp.float32,
                                  minval=0.1, maxval=2.0)

    fwd = jax.jit(custom_multi_loss_layer)
    result = jax.block_until_ready(fwd(loss_vec, log_vars))

    # Pure-JAX reference (this is also what a fused training step should use).
    ref = jnp.sum(jnp.exp(-log_vars) * loss_vec + log_vars)
    assert jnp.allclose(result, ref, rtol=1e-5, atol=1e-5), (result, ref)

    # Trainability check: gradients flow to both the losses and log_vars.
    g_loss, g_lv = jax.jit(jax.grad(custom_multi_loss_layer, argnums=(0, 1)))(
        loss_vec, log_vars)
    g_loss_ref = jnp.exp(-log_vars)
    g_lv_ref = 1.0 - jnp.exp(-log_vars) * loss_vec
    assert jnp.allclose(g_loss, g_loss_ref, rtol=1e-5, atol=1e-5)
    assert jnp.allclose(g_lv, g_lv_ref, rtol=1e-5, atol=1e-5)

    print("KERNEL_OK")
</pallas_src>

<mosaic_0001>
module attributes {stable_mosaic.version = 11 : i64} {
  func.func @_multi_loss_kernel(%arg0: memref<1x4xf32, #tpu.memory_space<vmem>>, %arg1: memref<1x4xf32, #tpu.memory_space<vmem>>, %arg2: memref<1x1xf32, #tpu.memory_space<smem>>) attributes {dimension_semantics = [], scalar_prefetch = 0 : i64, scratch_operands = 0 : i64, tpu.core_type = #tpu.core_type<tc>} {
    %c0 = arith.constant 0 : index
    %c0_0 = arith.constant 0 : index
    %0 = vector.load %arg0[%c0, %c0_0] : memref<1x4xf32, #tpu.memory_space<vmem>>, vector<1x4xf32>
    %c0_1 = arith.constant 0 : index
    %c0_2 = arith.constant 0 : index
    %1 = vector.load %arg1[%c0_1, %c0_2] : memref<1x4xf32, #tpu.memory_space<vmem>>, vector<1x4xf32>
    %cst = arith.constant 0.000000e+00 : f32
    %2 = vector.broadcast %cst : f32 to vector<1x4xf32>
    %3 = arith.subf %2, %1 : vector<1x4xf32>
    %4 = math.exp %3 : vector<1x4xf32>
    %5 = arith.mulf %4, %0 : vector<1x4xf32>
    %6 = arith.addf %5, %1 : vector<1x4xf32>
    %7 = vector.shape_cast %6 : vector<1x4xf32> to vector<1x1x4xf32>
    %cst_3 = arith.constant dense<0.000000e+00> : vector<1xf32>
    %8 = vector.multi_reduction <add>, %7, %cst_3 [1, 2] : vector<1x1x4xf32> to vector<1xf32>
    %9 = vector.shape_cast %8 : vector<1xf32> to vector<1x1x1xf32>
    %10 = vector.extract %9[0, 0, 0] : f32 from vector<1x1x1xf32>
    %c0_4 = arith.constant 0 : index
    %c0_5 = arith.constant 0 : index
    %11 = memref.load %arg2[%c0_4, %c0_5] : memref<1x1xf32, #tpu.memory_space<smem>>
    memref.store %10, %arg2[%c0_4, %c0_5] : memref<1x1xf32, #tpu.memory_space<smem>>
    return
  }
}

</mosaic_0001>

<bundles_post_ra>
// kernel: custom_multi_loss_layer.1
= control target key start
LH: loop header
LB: loop body
LE: loop exit
PB: predicated region body
PF: predicated region fallthrough
CT: control target
= control target key end

     0   :  { %s96_s0 = inlined_call_operand.vmem [shape: f32[1,4], index: 0, kind: input, shape index: {}]   ;;  %s97_s1 = inlined_call_operand.vmem [shape: f32[1,4], index: 1, kind: input, shape index: {}]   ;;  %s98_s2 = inlined_call_operand.hbm [shape: f32[1,1], index: 2, kind: output, shape index: {}]  }
   0x1   :  { %v13_v0 = vld [vmem:[%s97_s1] sm:$0x1] }
   0x2   :  { %v14_v1 = vsub.f32 0.0, %v13_v0 }
   0x3   :  { %7 = vsyncpa [#allocation3], 0  ;;  %v12_v3 = vld [vmem:[%s96_s0] sm:$0x1]  ;;  %vm19_vm0 = vcmask 24576   ;;  %s50_s0 = scalar_lea.hbm %s98_s2, 16 }
   0x4   :  { %v15_v2 = vmul.f32 1.442695, %v14_v1  ;;  %p51_p0 = scmp.ne.s32.totalorder %s98_s2, %s50_s0  ;;  %p54_p1 = scmp.lt.u32.totalorder %s50_s0, %s98_s2 }
   0x6   :  { %48 = vpow2.f32 %v15_v2  ;;  %p56_p2 = pnand %p54_p1, %p51_p0 }
  0x10   :  { %v49_v4 = vpop.eup %48 }
  0x11   :  { %v17_v5 = vmul.f32 %v49_v4, %v12_v3 }
  0x13   :  { %v18_v6 = vadd.f32 %v17_v5, %v13_v0 }
  0x15   :  { %v20_v7 = vsel %vm19_vm0, %v18_v6, 0.0 }
  0x16   :  { %21 = vadd.xlane.f32.xlu0 %v20_v7 }
  0xa3   :  { %v22_v8 = vpop.xlane.xlu0 %21 }
  0xa4   :  { %v23_v9 = vrot.slane %v22_v8, 4 }
  0xa6   :  { %v24_v10 = vadd.f32 %v23_v9, %v22_v8 }
  0xa8   :  { %v25_v11 = vrot.slane %v24_v10, 2 }
  0xaa   :  { %v26_v12 = vadd.f32 %v25_v11, %v24_v10 }
  0xac   :  { %v27_v13 = vrot.slane %v26_v12, 1 }
  0xae   :  { %v28_v14 = vadd.f32 %v27_v13, %v26_v12 }
  0xb0   :  { %45 = vpush %v28_v14 }
  0xe1   :  { %s46_s1 = spop %45 }
  0xe2   :  { %31 = sst [smem:[#allocation2]] %s46_s1 }
  0xe3   :  { %59 = shalt.err (!%p56_p2)
}
  0xe4   :  { %s62_s19 = smov [#allocation2]  }
  0xe5   :  { %39 = dma.smem_to_hbm %s62_s19, 16, %s98_s2, [#allocation3]  }
  0xe6   :  { %60 = dma.done.wait [#allocation3], 16  }
  0xe7   :  { %61 = vsyncadd [#allocation3], 4294967280 }
  0xe8   :  { %43 = sfence }
  0xe9   :  { %44 = vsyncpa [#allocation3], 1 }

</bundles_post_ra>
